<compile_context>
chip_gen: v7x
topology: tpu7x:2x2x1
jax: 0.10.0
libtpu: 0.0.40
codegen_flags: <defaults>
</compile_context>

<pallas_src>
import functools

import jax
import jax.numpy as jnp
from jax import lax
from jax.experimental import pallas as pl
from jax.experimental.pallas import tpu as pltpu

_F32_TINY = float(jnp.finfo(jnp.float32).tiny)   # smallest positive normal f32
_INV_2_24 = float(1.0 / 16777216.0)              # 2**-24
# Bytes allowed for ONE (b_blk, K, V) f32 tile; total VMEM ~ (4 buffers + temps)*tile.
_TILE_BUDGET_BYTES = 2 * 1024 * 1024


def _hash_u32(x):
    """Murmur3 finalizer: uint32 -> well-mixed uint32 (counter-based PRNG)."""
    x = x ^ (x >> 16)
    x = x * jnp.uint32(0x85EBCA6B)
    x = x ^ (x >> 13)
    x = x * jnp.uint32(0xC2B2AE35)
    x = x ^ (x >> 16)
    return x


def _bits_to_unit_f32(bits, *, open_interval):
    """uint32 bits -> float32 uniform.  [0,1) if closed, (0,1) if open_interval."""
    b24 = (bits >> 8).astype(jnp.int32)           # < 2**24, fits int32 exactly
    f = b24.astype(jnp.float32)
    if open_interval:
        f = f + 0.5
    return f * _INV_2_24


def _rejection_kernel(seed_ref,            # SMEM (1,) int32   (scalar prefetch)
                      target_ref,          # VMEM (b_blk, K, V)   f32
                      draft_ref,           # VMEM (b_blk, K, V)   f32
                      ids_ref,             # VMEM (b_blk, K, 1)   i32
                      bonus_ref,           # VMEM (b_blk, 1, 1)   i32
                      out_ref,             # VMEM (b_blk, K+1, 1) i32
                      *, disable_bonus: bool):
    b_blk, K, V = target_ref.shape
    blk = pl.program_id(0)
    seed = seed_ref[0].astype(jnp.uint32)

    t = target_ref[...]                                   # (b_blk, K, V)
    d = draft_ref[...]                                    # (b_blk, K, V)
    ids = ids_ref[...]                                    # (b_blk, K, 1) int32

    # ---- counter-based PRNG streams (deterministic, per global element) ----
    seq = lax.broadcasted_iota(jnp.int32, (b_blk, K, V), 0) + blk * b_blk
    kpos = lax.broadcasted_iota(jnp.int32, (b_blk, K, V), 1)
    vpos = lax.broadcasted_iota(jnp.int32, (b_blk, K, V), 2)
    row = seq * K + kpos                                  # global (b, k) row id
    ctr = (row * V + vpos).astype(jnp.uint32)

    # Exp(1) noise for the Gumbel-style multinomial (full (K, V) tile).
    bits_q = _hash_u32(ctr ^ (seed * jnp.uint32(0x9E3779B1)) ^ jnp.uint32(0x85297A4D))
    u_q = _bits_to_unit_f32(bits_q, open_interval=True)   # (0,1): log is finite, q > 0
    q = -jnp.log(u_q)                                     # Exp(1) samples

    # Acceptance uniforms: ONE per (b, k) row (small block, not (K, V)).
    seq_s = lax.broadcasted_iota(jnp.int32, (b_blk, K, 1), 0) + blk * b_blk
    kpos_s = lax.broadcasted_iota(jnp.int32, (b_blk, K, 1), 1)
    row_s = (seq_s * K + kpos_s).astype(jnp.uint32)
    bits_a = _hash_u32(row_s ^ (seed * jnp.uint32(0x3C6EF35F)) ^ jnp.uint32(0x1B873593))
    u_acc = _bits_to_unit_f32(bits_a, open_interval=False)        # (b_blk, K, 1) in [0,1)

    # ---- _get_accepted (fused): u < min(1, t_id/d_id)  <=>  t_id - u*d_id > 0 ----
    onehot = vpos == ids                                           # (b_blk, K, V) bool
    acc_stat = jnp.sum(jnp.where(onehot, t - u_acc * d, 0.0),
                       axis=2, keepdims=True)                      # (b_blk, K, 1)
    accepted = acc_stat > 0.0                                      # (b_blk, K, 1) bool

    # ---- _get_recovered_probs + _multinomial(1): argmax(f / Exp(1)) ----
    f = jnp.maximum(t - d, _F32_TINY)
    scores = f / q                                                 # normalization dropped
    mx = jnp.max(scores, axis=2, keepdims=True)
    vpos_f = vpos.astype(jnp.float32)
    rec_f = jnp.min(jnp.where(scores == mx, vpos_f, float(V)),
                    axis=2, keepdims=True)                         # first argmax index
    rec_ids = rec_f.astype(jnp.int32)                              # (b_blk, K, 1)

    # ---- _create_output ----
    kk = kpos_s.astype(jnp.float32)                                # (b_blk, K, 1)
    cand = jnp.where(accepted, float(K), kk)
    limit = jnp.min(cand, axis=1, keepdims=True)                   # (b_blk, 1, 1) first rejection (K if none)

    neg1 = jnp.full((b_blk, K, 1), -1, jnp.int32)
    out_core = jnp.where(kk < limit, ids, neg1)                    # accepted draft tokens
    out_core = jnp.where(kk == limit, rec_ids, out_core)           # recovered token at rejection
    out_ref[:, 0:K, :] = out_core

    neg1_col = jnp.full((b_blk, 1, 1), -1, jnp.int32)
    if disable_bonus:
        out_ref[:, K:K + 1, :] = neg1_col
    else:
        all_accepted = limit == float(K)                           # (b_blk, 1, 1) bool
        out_ref[:, K:K + 1, :] = jnp.where(all_accepted, bonus_ref[...], neg1_col)


def rejection_sample(target_probs, bonus_token_ids, draft_probs, draft_token_ids,
                     *, seed=0, disable_bonus_tokens=True, block_batch=None):
    """Pallas-TPU rejection sampler.

    target_probs, draft_probs : [B, K, V] float32
    bonus_token_ids           : [B, 1]    int
    draft_token_ids           : [B, K]    int
    returns                   : [B, K+1]  int32
    """
    B, K, V = target_probs.shape

    # --- choose how many sequences to process per grid step (VMEM budget) ---
    if block_batch is None:
        tile_bytes = K * V * 4
        b_blk = max(1, _TILE_BUDGET_BYTES // max(tile_bytes, 1))
    else:
        b_blk = int(block_batch)
    b_blk = int(min(max(b_blk, 1), B))
    num_blocks = -(-B // b_blk)
    B_pad = num_blocks * b_blk
    pad = B_pad - B

    tp = target_probs.astype(jnp.float32)
    dp = draft_probs.astype(jnp.float32)
    ids3 = draft_token_ids.astype(jnp.int32).reshape(B, K, 1)
    bonus3 = bonus_token_ids.astype(jnp.int32).reshape(B, 1, 1)
    if pad:
        tp = jnp.pad(tp, ((0, pad), (0, 0), (0, 0)))
        dp = jnp.pad(dp, ((0, pad), (0, 0), (0, 0)))
        ids3 = jnp.pad(ids3, ((0, pad), (0, 0), (0, 0)))
        bonus3 = jnp.pad(bonus3, ((0, pad), (0, 0), (0, 0)))

    seed_arr = jnp.asarray([seed], dtype=jnp.int32)
    kernel = functools.partial(_rejection_kernel,
                               disable_bonus=bool(disable_bonus_tokens))

    out = pl.pallas_call(
        kernel,
        out_shape=jax.ShapeDtypeStruct((B_pad, K + 1, 1), jnp.int32),
        grid_spec=pltpu.PrefetchScalarGridSpec(
            num_scalar_prefetch=1,
            grid=(num_blocks,),
            in_specs=[
                pl.BlockSpec((b_blk, K, V), lambda i, _s: (i, 0, 0)),
                pl.BlockSpec((b_blk, K, V), lambda i, _s: (i, 0, 0)),
                pl.BlockSpec((b_blk, K, 1), lambda i, _s: (i, 0, 0)),
                pl.BlockSpec((b_blk, 1, 1), lambda i, _s: (i, 0, 0)),
            ],
            out_specs=pl.BlockSpec((b_blk, K + 1, 1), lambda i, _s: (i, 0, 0)),
        ),
        compiler_params=pltpu.CompilerParams(
            dimension_semantics=("parallel",),          # batch axis is independent
            vmem_limit_bytes=48 * 1024 * 1024),
        cost_estimate=pl.CostEstimate(
            flops=int(30 * B_pad * K * V),
            transcendentals=int(B_pad * K * V),
            bytes_accessed=int(2 * B_pad * K * V * 4)),
    )(seed_arr, tp, dp, ids3, bonus3)

    return out.reshape(B_pad, K + 1)[:B]


if __name__ == "__main__":
    B, K, V = 2, 4, 128
    key = jax.random.PRNGKey(0)
    k1, k2, k3, k4 = jax.random.split(key, 4)

    target_probs = jax.nn.softmax(jax.random.normal(k1, (B, K, V), jnp.float32), axis=-1)
    draft_probs = jax.nn.softmax(jax.random.normal(k2, (B, K, V), jnp.float32), axis=-1)
    draft_token_ids = jax.random.randint(k3, (B, K), 0, V, jnp.int32)
    bonus_token_ids = jax.random.randint(k4, (B, 1), 0, V, jnp.int32)

    out = rejection_sample(target_probs, bonus_token_ids, draft_probs,
                           draft_token_ids, seed=1234,
                           disable_bonus_tokens=True)
    out = jax.block_until_ready(out)

    assert out.shape == (B, K + 1) and out.dtype == jnp.int32
    # every entry is -1 or a valid vocab id
    assert bool(jnp.all((out >= -1) & (out < V)))
    # once a position is -1, all later speculative positions stay -1
    core_neg = out[:, :K] == -1
    assert not bool(jnp.any((jnp.cumsum(core_neg.astype(jnp.int32), axis=1) > 0) & (~core_neg)))
    # bonus column is disabled by default
    assert bool(jnp.all(out[:, K] == -1))
    print("KERNEL_OK")
</pallas_src>

<mosaic_0001>
module attributes {stable_mosaic.version = 11 : i64} {
  func.func @_rejection_kernel(%arg0: i32, %arg1: memref<1xi32, #tpu.memory_space<smem>>, %arg2: memref<2x4x128xf32, #tpu.memory_space<vmem>>, %arg3: memref<2x4x128xf32, #tpu.memory_space<vmem>>, %arg4: memref<2x4x1xi32, #tpu.memory_space<vmem>>, %arg5: memref<2x1x1xi32, #tpu.memory_space<vmem>>, %arg6: memref<2x5x1xi32, #tpu.memory_space<vmem>>) attributes {dimension_semantics = [#tpu.dimension_semantics<parallel>], iteration_bounds = array<i64: 1>, scalar_prefetch = 1 : i64, scratch_operands = 0 : i64, tpu.core_type = #tpu.core_type<tc>, window_params = [{transform_indices = @transform_0, window_bounds = array<i64: 2, 4, 128>}, {transform_indices = @transform_1, window_bounds = array<i64: 2, 4, 128>}, {transform_indices = @transform_2, window_bounds = array<i64: 2, 4, 1>}, {transform_indices = @transform_3, window_bounds = array<i64: 2, 1, 1>}, {transform_indices = @transform_4, window_bounds = array<i64: 2, 5, 1>}]} {
    %c0 = arith.constant 0 : index
    %0 = memref.load %arg1[%c0] : memref<1xi32, #tpu.memory_space<smem>>
    %c0_0 = arith.constant 0 : index
    %c0_1 = arith.constant 0 : index
    %c0_2 = arith.constant 0 : index
    %1 = vector.load %arg2[%c0_0, %c0_1, %c0_2] : memref<2x4x128xf32, #tpu.memory_space<vmem>>, vector<2x4x128xf32>
    %c0_3 = arith.constant 0 : index
    %c0_4 = arith.constant 0 : index
    %c0_5 = arith.constant 0 : index
    %2 = vector.load %arg3[%c0_3, %c0_4, %c0_5] : memref<2x4x128xf32, #tpu.memory_space<vmem>>, vector<2x4x128xf32>
    %c0_6 = arith.constant 0 : index
    %c0_7 = arith.constant 0 : index
    %c0_8 = arith.constant 0 : index
    %3 = vector.load %arg4[%c0_6, %c0_7, %c0_8] : memref<2x4x1xi32, #tpu.memory_space<vmem>>, vector<2x4x1xi32>
    %4 = tpu.iota {dimensions = array<i32: 0>} : vector<2x4x128xi32>
    %c2_i32 = arith.constant 2 : i32
    %5 = arith.muli %arg0, %c2_i32 : i32
    %6 = vector.broadcast %5 : i32 to vector<2x4x128xi32>
    %7 = arith.addi %4, %6 : vector<2x4x128xi32>
    %8 = tpu.iota {dimensions = array<i32: 1>} : vector<2x4x128xi32>
    %9 = tpu.iota {dimensions = array<i32: 2>} : vector<2x4x128xi32>
    %c4_i32 = arith.constant 4 : i32
    %10 = vector.broadcast %c4_i32 : i32 to vector<2x4x128xi32>
    %11 = arith.muli %7, %10 : vector<2x4x128xi32>
    %12 = arith.addi %11, %8 : vector<2x4x128xi32>
    %c128_i32 = arith.constant 128 : i32
    %13 = vector.broadcast %c128_i32 : i32 to vector<2x4x128xi32>
    %14 = arith.muli %12, %13 : vector<2x4x128xi32>
    %15 = arith.addi %14, %9 : vector<2x4x128xi32>
    %c-1640531535_i32 = arith.constant -1640531535 : i32
    %16 = arith.muli %0, %c-1640531535_i32 : i32
    %17 = vector.broadcast %16 : i32 to vector<2x4x128xi32>
    %18 = arith.xori %15, %17 : vector<2x4x128xi32>
    %c-2060879283_i32 = arith.constant -2060879283 : i32
    %19 = vector.broadcast %c-2060879283_i32 : i32 to vector<2x4x128xi32>
    %20 = arith.xori %18, %19 : vector<2x4x128xi32>
    %c16_i32 = arith.constant 16 : i32
    %21 = vector.broadcast %c16_i32 : i32 to vector<2x4x128xi32>
    %22 = arith.shrui %20, %21 : vector<2x4x128xi32>
    %23 = arith.xori %20, %22 : vector<2x4x128xi32>
    %c-2048144789_i32 = arith.constant -2048144789 : i32
    %24 = vector.broadcast %c-2048144789_i32 : i32 to vector<2x4x128xi32>
    %25 = arith.muli %23, %24 : vector<2x4x128xi32>
    %c13_i32 = arith.constant 13 : i32
    %26 = vector.broadcast %c13_i32 : i32 to vector<2x4x128xi32>
    %27 = arith.shrui %25, %26 : vector<2x4x128xi32>
    %28 = arith.xori %25, %27 : vector<2x4x128xi32>
    %c-1028477387_i32 = arith.constant -1028477387 : i32
    %29 = vector.broadcast %c-1028477387_i32 : i32 to vector<2x4x128xi32>
    %30 = arith.muli %28, %29 : vector<2x4x128xi32>
    %c16_i32_9 = arith.constant 16 : i32
    %31 = vector.broadcast %c16_i32_9 : i32 to vector<2x4x128xi32>
    %32 = arith.shrui %30, %31 : vector<2x4x128xi32>
    %33 = arith.xori %30, %32 : vector<2x4x128xi32>
    %c8_i32 = arith.constant 8 : i32
    %34 = vector.broadcast %c8_i32 : i32 to vector<2x4x128xi32>
    %35 = arith.shrui %33, %34 : vector<2x4x128xi32>
    %36 = arith.sitofp %35 : vector<2x4x128xi32> to vector<2x4x128xf32>
    %cst = arith.constant 5.000000e-01 : f32
    %37 = vector.broadcast %cst : f32 to vector<2x4x128xf32>
    %38 = arith.addf %36, %37 : vector<2x4x128xf32>
    %cst_10 = arith.constant 5.96046448E-8 : f32
    %39 = vector.broadcast %cst_10 : f32 to vector<2x4x128xf32>
    %40 = arith.mulf %38, %39 : vector<2x4x128xf32>
    %41 = math.log %40 : vector<2x4x128xf32>
    %cst_11 = arith.constant 0.000000e+00 : f32
    %42 = vector.broadcast %cst_11 : f32 to vector<2x4x128xf32>
    %43 = arith.subf %42, %41 : vector<2x4x128xf32>
    %44 = tpu.iota {dimensions = array<i32: 0>} : vector<2x4x1xi32>
    %c2_i32_12 = arith.constant 2 : i32
    %45 = arith.muli %arg0, %c2_i32_12 : i32
    %46 = vector.broadcast %45 : i32 to vector<2x4x1xi32>
    %47 = arith.addi %44, %46 : vector<2x4x1xi32>
    %48 = tpu.iota {dimensions = array<i32: 1>} : vector<2x4x1xi32>
    %c4_i32_13 = arith.constant 4 : i32
    %49 = vector.broadcast %c4_i32_13 : i32 to vector<2x4x1xi32>
    %50 = arith.muli %47, %49 : vector<2x4x1xi32>
    %51 = arith.addi %50, %48 : vector<2x4x1xi32>
    %c1013904223_i32 = arith.constant 1013904223 : i32
    %52 = arith.muli %0, %c1013904223_i32 : i32
    %53 = vector.broadcast %52 : i32 to vector<2x4x1xi32>
    %54 = arith.xori %51, %53 : vector<2x4x1xi32>
    %c461845907_i32 = arith.constant 461845907 : i32
    %55 = vector.broadcast %c461845907_i32 : i32 to vector<2x4x1xi32>
    %56 = arith.xori %54, %55 : vector<2x4x1xi32>
    %c16_i32_14 = arith.constant 16 : i32
    %57 = vector.broadcast %c16_i32_14 : i32 to vector<2x4x1xi32>
    %58 = arith.shrui %56, %57 : vector<2x4x1xi32>
    %59 = arith.xori %56, %58 : vector<2x4x1xi32>
    %c-2048144789_i32_15 = arith.constant -2048144789 : i32
    %60 = vector.broadcast %c-2048144789_i32_15 : i32 to vector<2x4x1xi32>
    %61 = arith.muli %59, %60 : vector<2x4x1xi32>
    %c13_i32_16 = arith.constant 13 : i32
    %62 = vector.broadcast %c13_i32_16 : i32 to vector<2x4x1xi32>
    %63 = arith.shrui %61, %62 : vector<2x4x1xi32>
    %64 = arith.xori %61, %63 : vector<2x4x1xi32>
    %c-1028477387_i32_17 = arith.constant -1028477387 : i32
    %65 = vector.broadcast %c-1028477387_i32_17 : i32 to vector<2x4x1xi32>
    %66 = arith.muli %64, %65 : vector<2x4x1xi32>
    %c16_i32_18 = arith.constant 16 : i32
    %67 = vector.broadcast %c16_i32_18 : i32 to vector<2x4x1xi32>
    %68 = arith.shrui %66, %67 : vector<2x4x1xi32>
    %69 = arith.xori %66, %68 : vector<2x4x1xi32>
    %c8_i32_19 = arith.constant 8 : i32
    %70 = vector.broadcast %c8_i32_19 : i32 to vector<2x4x1xi32>
    %71 = arith.shrui %69, %70 : vector<2x4x1xi32>
    %72 = arith.sitofp %71 : vector<2x4x1xi32> to vector<2x4x1xf32>
    %cst_20 = arith.constant 5.96046448E-8 : f32
    %73 = vector.broadcast %cst_20 : f32 to vector<2x4x1xf32>
    %74 = arith.mulf %72, %73 : vector<2x4x1xf32>
    %75 = vector.broadcast %3 : vector<2x4x1xi32> to vector<2x4x128xi32>
    %76 = arith.cmpi eq, %9, %75 : vector<2x4x128xi32>
    %77 = vector.broadcast %74 : vector<2x4x1xf32> to vector<2x4x128xf32>
    %78 = arith.mulf %77, %2 : vector<2x4x128xf32>
    %79 = arith.subf %1, %78 : vector<2x4x128xf32>
    %cst_21 = arith.constant 0.000000e+00 : f32
    %80 = vector.broadcast %cst_21 : f32 to vector<2x4x128xf32>
    %81 = arith.select %76, %79, %80 : vector<2x4x128xi1>, vector<2x4x128xf32>
    %cst_22 = arith.constant dense<0.000000e+00> : vector<2x4xf32>
    %82 = vector.multi_reduction <add>, %81, %cst_22 [2] : vector<2x4x128xf32> to vector<2x4xf32>
    %83 = vector.shape_cast %82 : vector<2x4xf32> to vector<2x4x1xf32>
    %cst_23 = arith.constant 0.000000e+00 : f32
    %84 = vector.broadcast %cst_23 : f32 to vector<2x4x1xf32>
    %85 = arith.cmpf ogt, %83, %84 : vector<2x4x1xf32>
    %86 = arith.subf %1, %2 : vector<2x4x128xf32>
    %cst_24 = arith.constant 1.17549435E-38 : f32
    %87 = vector.broadcast %cst_24 : f32 to vector<2x4x128xf32>
    %88 = arith.maximumf %86, %87 : vector<2x4x128xf32>
    %89 = arith.divf %88, %43 : vector<2x4x128xf32>
    %cst_25 = arith.constant dense<0xFF800000> : vector<2x4xf32>
    %90 = vector.multi_reduction <maximumf>, %89, %cst_25 [2] : vector<2x4x128xf32> to vector<2x4xf32>
    %91 = vector.shape_cast %90 : vector<2x4xf32> to vector<2x4x1xf32>
    %92 = arith.sitofp %9 : vector<2x4x128xi32> to vector<2x4x128xf32>
    %93 = vector.broadcast %91 : vector<2x4x1xf32> to vector<2x4x128xf32>
    %94 = arith.cmpf oeq, %89, %93 : vector<2x4x128xf32>
    %cst_26 = arith.constant 1.280000e+02 : f32
    %95 = vector.broadcast %cst_26 : f32 to vector<2x4x128xf32>
    %96 = arith.select %94, %92, %95 : vector<2x4x128xi1>, vector<2x4x128xf32>
    %cst_27 = arith.constant dense<0x7F800000> : vector<2x4xf32>
    %97 = vector.multi_reduction <minimumf>, %96, %cst_27 [2] : vector<2x4x128xf32> to vector<2x4xf32>
    %98 = vector.shape_cast %97 : vector<2x4xf32> to vector<2x4x1xf32>
    %99 = arith.fptosi %98 : vector<2x4x1xf32> to vector<2x4x1xi32>
    %100 = arith.sitofp %48 : vector<2x4x1xi32> to vector<2x4x1xf32>
    %cst_28 = arith.constant 4.000000e+00 : f32
    %101 = vector.broadcast %cst_28 : f32 to vector<2x4x1xf32>
    %102 = arith.select %85, %101, %100 : vector<2x4x1xi1>, vector<2x4x1xf32>
    %cst_29 = arith.constant dense<0x7F800000> : vector<2x1xf32>
    %103 = vector.multi_reduction <minimumf>, %102, %cst_29 [1] : vector<2x4x1xf32> to vector<2x1xf32>
    %104 = vector.shape_cast %103 : vector<2x1xf32> to vector<2x1x1xf32>
    %c-1_i32 = arith.constant -1 : i32
    %105 = vector.broadcast %c-1_i32 : i32 to vector<2x4x1xi32>
    %106 = vector.broadcast %104 : vector<2x1x1xf32> to vector<2x4x1xf32>
    %107 = arith.cmpf olt, %100, %106 : vector<2x4x1xf32>
    %108 = arith.select %107, %3, %105 : vector<2x4x1xi1>, vector<2x4x1xi32>
    %109 = vector.broadcast %104 : vector<2x1x1xf32> to vector<2x4x1xf32>
    %110 = arith.cmpf oeq, %100, %109 : vector<2x4x1xf32>
    %111 = arith.select %110, %99, %108 : vector<2x4x1xi1>, vector<2x4x1xi32>
    %c0_30 = arith.constant 0 : index
    %c0_31 = arith.constant 0 : index
    %c0_32 = arith.constant 0 : index
    %112 = vector.load %arg6[%c0_30, %c0_31, %c0_32] : memref<2x5x1xi32, #tpu.memory_space<vmem>>, vector<2x4x1xi32>
    tpu.vector_store %arg6[%c0_30, %c0_31, %c0_32], %111 {strides = array<i32>} : memref<2x5x1xi32, #tpu.memory_space<vmem>>, vector<2x4x1xi32>,
    %c-1_i32_33 = arith.constant -1 : i32
    %113 = vector.broadcast %c-1_i32_33 : i32 to vector<2x1x1xi32>
    %c0_34 = arith.constant 0 : index
    %c4 = arith.constant 4 : index
    %c0_35 = arith.constant 0 : index
    %114 = vector.load %arg6[%c0_34, %c4, %c0_35] : memref<2x5x1xi32, #tpu.memory_space<vmem>>, vector<2x1x1xi32>
    tpu.vector_store %arg6[%c0_34, %c4, %c0_35], %113 {strides = array<i32>} : memref<2x5x1xi32, #tpu.memory_space<vmem>>, vector<2x1x1xi32>,
    return
  }
  func.func @transform_0(%arg0: i32, %arg1: memref<1xi32, #tpu.memory_space<smem>>) -> (i32, i32, i32) {
    %c0_i32 = arith.constant 0 : i32
    %c0_i32_0 = arith.constant 0 : i32
    %c0_i32_1 = arith.constant 0 : i32
    return %arg0, %c0_i32, %c0_i32_0 : i32, i32, i32
  }
  func.func @transform_1(%arg0: i32, %arg1: memref<1xi32, #tpu.memory_space<smem>>) -> (i32, i32, i32) {
    %c0_i32 = arith.constant 0 : i32
    %c0_i32_0 = arith.constant 0 : i32
    %c0_i32_1 = arith.constant 0 : i32
    return %arg0, %c0_i32, %c0_i32_0 : i32, i32, i32
  }
  func.func @transform_2(%arg0: i32, %arg1: memref<1xi32, #tpu.memory_space<smem>>) -> (i32, i32, i32) {
    %c0_i32 = arith.constant 0 : i32
    %c0_i32_0 = arith.constant 0 : i32
    %c0_i32_1 = arith.constant 0 : i32
    return %arg0, %c0_i32, %c0_i32_0 : i32, i32, i32
  }
  func.func @transform_3(%arg0: i32, %arg1: memref<1xi32, #tpu.memory_space<smem>>) -> (i32, i32, i32) {
    %c0_i32 = arith.constant 0 : i32
    %c0_i32_0 = arith.constant 0 : i32
    %c0_i32_1 = arith.constant 0 : i32
    return %arg0, %c0_i32, %c0_i32_0 : i32, i32, i32
  }
  func.func @transform_4(%arg0: i32, %arg1: memref<1xi32, #tpu.memory_space<smem>>) -> (i32, i32, i32) {
    %c0_i32 = arith.constant 0 : i32
    %c0_i32_0 = arith.constant 0 : i32
    %c0_i32_1 = arith.constant 0 : i32
    return %arg0, %c0_i32, %c0_i32_0 : i32, i32, i32
  }
}

</mosaic_0001>

<bundles_post_ra>
// kernel: tpu_custom_call.1
= control target key start
LH: loop header
LB: loop body
LE: loop exit
PB: predicated region body
PF: predicated region fallthrough
CT: control target
= control target key end

     0   :  { %v29_v0 = vlaneseq  ;;  %v205_v1 = vmov 0   ;;  %vm119_vm0 = vcmask 1043456   ;;  %vm183_vm3 = vcmask 0   ;;  %s302_s3 = inlined_call_operand.vmem [shape: s32[2,4,1], index: 3, kind: input, shape index: {}]   ;;  %s303_s0 = inlined_call_operand.<no memory space> [shape: s32[1], index: 0, kind: input, shape index: {}]   ;;  %s304_s4 = inlined_call_operand.vmem [shape: s32[2,1,1], index: 4, kind: input, shape index: {}]   ;;  %s305_s2 = inlined_call_operand.vmem [shape: f32[2,4,128], index: 2, kind: input, shape index: {}]   ;;  %s306_s1 = inlined_call_operand.vmem [shape: f32[2,4,128], index: 1, kind: input, shape index: {}]   ;;  %s307_s5 = inlined_call_operand.vmem [shape: s32[2,5,1], index: 5, kind: output, shape index: {}]  }
   0x1   :  { %196 = vset.pattern.permute.xlu0 %v205_v1  ;;  %v240_v2 = vld [vmem:[%s302_s3] sm:$0xf]  ;;  %s41_s21 = smul.u32 2654435761, %s303_s0  ;;  %v253_v5 = vld [vmem:[%s302_s3 + $0x4] sm:$0xf] }
   0x2   :  { %106 = vperm.xlu0 %196, %v240_v2   ;;  %v243_v3 = vshrl.u32 %v29_v0, 7  ;;  %v245_v4 = vand.u32 127, %v29_v0  ;;  %s77_s26 = smul.u32 1013904223, %s303_s0  ;;  %v22_v0 = vld [vmem:[%s305_s2] sm:$0xf] }
   0x3   :  { %v42_v8 = vstv %s41_s21  ;;  %vm180_vm9 = vcmask 3072  }
   0x4   :  { %v37_v6 = vmul.u32 128, %v243_v3  ;;  %v36_v7 = vadd.s32 4, %v243_v3  ;;  %v78_v13 = vstv %s77_s26 }
   0x5   :  { %v79_v14 = vxor.u32 %v78_v13, %v243_v3 }
   0x6   :  { %109 = vperm.xlu0 %196, %v253_v5   ;;  %v39_v9 = vadd.s32 %v37_v6, %v245_v4  ;;  %v38_v10 = vmul.u32 128, %v36_v7  ;;  %v80_v15 = vxor.u32 %v78_v13, %v36_v7  ;;  %v23_v6 = vld [vmem:[%s305_s2 + $0x4] sm:$0xf] }
   0x7   :  { %v81_v18 = vxor.u32 461845907, %v79_v14 }
   0x8   :  { %v43_v11 = vxor.u32 %v42_v8, %v39_v9  ;;  %v40_v12 = vadd.s32 %v38_v10, %v245_v4  ;;  %v82_v19 = vxor.u32 461845907, %v80_v15  ;;  %v20_v10 = vld [vmem:[%s306_s1] sm:$0xf] }
   0x9   :  { %v83_v22 = vshrl.u32 %v81_v18, 16 }
   0xa   :  { %v45_v16 = vxor.u32 2234088013, %v43_v11  ;;  %v44_v17 = vxor.u32 %v42_v8, %v40_v12  ;;  %v84_v23 = vshrl.u32 %v82_v19, 16  ;;  %v21_v11 = vld [vmem:[%s306_s1 + $0x4] sm:$0xf] }
   0xb   :  { %v85_v26 = vxor.u32 %v83_v22, %v81_v18  ;;  %v129_v22 = vsub.f32 %v21_v11, %v23_v6 }
   0xc   :  { %v47_v20 = vshrl.u32 %v45_v16, 16  ;;  %v46_v21 = vxor.u32 2234088013, %v44_v17  ;;  %v86_v27 = vxor.u32 %v84_v23, %v82_v19 }
   0xd   :  { %v87_v30 = vmul.u32 2246822507, %v85_v26 }
   0xe   :  { %v49_v24 = vxor.u32 %v47_v20, %v45_v16  ;;  %v48_v25 = vshrl.u32 %v46_v21, 16  ;;  %v88_v31 = vmul.u32 2246822507, %v86_v27 }
   0xf   :  { %v89_v34 = vshrl.u32 %v87_v30, 13 }
  0x10   :  { %v51_v28 = vmul.u32 2246822507, %v49_v24  ;;  %v50_v29 = vxor.u32 %v48_v25, %v46_v21  ;;  %v90_v35 = vshrl.u32 %v88_v31, 13  ;;  %v128_v21 = vsub.f32 %v20_v10, %v22_v0 }
  0x11   :  { %v91_v38 = vxor.u32 %v89_v34, %v87_v30  ;;  %v131_v24 = vmax.f32 %v129_v22, 1.1754944e-38 }
  0x12   :  { %v53_v32 = vshrl.u32 %v51_v28, 13  ;;  %v52_v33 = vmul.u32 2246822507, %v50_v29  ;;  %v92_v39 = vxor.u32 %v90_v35, %v88_v31  ;;  %v130_v23 = vmax.f32 %v128_v21, 1.1754944e-38 }
  0x13   :  { %v93_v42 = vmul.u32 3266489909, %v91_v38  ;;  %v142_v38 = vcvt.s32.f32 %v245_v4 }
  0x14   :  { %v55_v36 = vxor.u32 %v53_v32, %v51_v28  ;;  %v54_v37 = vshrl.u32 %v52_v33, 13  ;;  %v94_v43 = vmul.u32 3266489909, %v92_v39 }
  0x15   :  { %v95_v46 = vshrl.u32 %v93_v42, 16 }
  0x16   :  { %v57_v40 = vmul.u32 3266489909, %v55_v36  ;;  %v56_v41 = vxor.u32 %v54_v37, %v52_v33  ;;  %v96_v47 = vshrl.u32 %v94_v43, 16  ;;  %v206_v37 = vmov 4294967295  }
  0x17   :  { %v97_v50 = vxor.u32 %v95_v46, %v93_v42  ;;  %184 = vst.msk [vmem:[%s307_s5 + $0x4] sm:$0x1] %vm183_vm3, %v206_v37  ;;  %185 = vst.msk [vmem:[%s307_s5 + $0xc] sm:$0x1] %vm183_vm3, %v206_v37  ;;  %v155_v46 = vcvt.s32.f32 %v243_v3 }
  0x18   :  { %v59_v44 = vshrl.u32 %v57_v40, 16  ;;  %v58_v45 = vmul.u32 3266489909, %v56_v41  ;;  %v98_v51 = vxor.u32 %v96_v47, %v94_v43 }
  0x19   :  { %v99_v54 = vshrl.u32 %v97_v50, 8 }
  0x1a   :  { %v61_v48 = vxor.u32 %v59_v44, %v57_v40  ;;  %v60_v49 = vshrl.u32 %v58_v45, 16  ;;  %v100_v55 = vshrl.u32 %v98_v51, 8 }
  0x1b   :  { %v101_v58 = vcvt.s32.f32 %v99_v54 }
  0x1c   :  { %v63_v52 = vshrl.u32 %v61_v48, 8  ;;  %v62_v53 = vxor.u32 %v60_v49, %v58_v45  ;;  %v102_v59 = vcvt.s32.f32 %v100_v55 }
  0x1d   :  { %v103_v62 = vmul.f32 5.9604645e-08, %v101_v58 }
  0x1e   :  { %v65_v56 = vcvt.s32.f32 %v63_v52  ;;  %v64_v57 = vshrl.u32 %v62_v53, 8  ;;  %v104_v63 = vmul.f32 5.9604645e-08, %v102_v59 }
  0x1f   :  { %v113_v8 = vmul.f32 %v103_v62, %v22_v0 }
  0x20   :  { %v67_v60 = vadd.f32 0.5, %v65_v56  ;;  %v66_v61 = vcvt.s32.f32 %v64_v57  ;;  %v114_v9 = vmul.f32 %v104_v63, %v23_v6 }
  0x21   :  { %v115_v13 = vsub.f32 %v20_v10, %v113_v8 }
  0x22   :  { %v69_v1 = vmul.f32 5.9604645e-08, %v67_v60  ;;  %v68_v7 = vadd.f32 0.5, %v66_v61  ;;  %v116_v14 = vsub.f32 %v21_v11, %v114_v9 }
  0x24   :  { %197 = vlog2.f32 %v69_v1  ;;  %v70_v12 = vmul.f32 5.9604645e-08, %v68_v7 }
  0x26   :  { %199 = vlog2.f32 %v70_v12 }
  0x2e   :  { %v198_v15 = vpop.eup %197 }
  0x2f   :  { %v72_v16 = vmul.f32 0.6931472, %v198_v15 }
  0x30   :  { %v200_v17 = vpop.eup %199 }
  0x31   :  { %v75_v18 = vsub.f32 0.0, %v72_v16  ;;  %v74_v19 = vmul.f32 0.6931472, %v200_v17 }
  0x33   :  { %201 = vrcp.f32 %v75_v18  ;;  %v76_v20 = vsub.f32 0.0, %v74_v19 }
  0x35   :  { %203 = vrcp.f32 %v76_v20 }
  0x3d   :  { %v202_v25 = vpop.eup %201 }
  0x3e   :  { %v133_v26 = vmul.f32 %v202_v25, %v130_v23 }
  0x3f   :  { %v204_v27 = vpop.eup %203 }
  0x40   :  { %v136_v28 = vsel %vm119_vm0, %v133_v26, -inf  ;;  %v135_v29 = vmul.f32 %v204_v27, %v131_v24 }
  0x41   :  { %137 = vmax.xlane.f32.xlu1 %v136_v28 }
  0x42   :  { %v139_v30 = vsel %vm119_vm0, %v135_v29, -inf }
  0x45   :  { %140 = vmax.xlane.f32.xlu1 %v139_v30 }
  0x81   :  { %v107_v31 = vpop.permute.xlu0 %106 }
  0x82   :  { %vm111_vm1 = vcmp.eq.s32.totalorder %v245_v4, %v107_v31 }
  0x83   :  { %v117_v32 = vsel %vm111_vm1, %v115_v13, 0.0 }
  0x84   :  { %v120_v33 = vsel %vm119_vm0, %v117_v32, 0.0 }
  0x85   :  { %v110_v34 = vpop.permute.xlu0 %109  ;;  %121 = vadd.xlane.f32.xlu0 %v120_v33 }
  0x86   :  { %vm112_vm2 = vcmp.eq.s32.totalorder %v245_v4, %v110_v34 }
  0x87   :  { %v118_v35 = vsel %vm112_vm2, %v116_v14, 0.0 }
  0x88   :  { %v123_v36 = vsel %vm119_vm0, %v118_v35, 0.0 }
  0x89   :  { %124 = vadd.xlane.f32.xlu1 %v123_v36 }
  0xce   :  { %v138_v39 = vpop.xlane.xlu1 %137 }
  0xcf   :  { %vm143_vm4 = vcmp.eq.f32.partialorder %v133_v26, %v138_v39 }
  0xd0   :  { %v145_v40 = vsel %vm143_vm4, %v142_v38, 128.0 }
  0xd1   :  { %v147_v41 = vsel %vm119_vm0, %v145_v40, inf }
  0xd2   :  { %148 = vmin.xlane.f32.xlu1 %v147_v41  ;;  %v141_v42 = vpop.xlane.xlu1 %140 }
  0xd3   :  { %vm144_vm5 = vcmp.eq.f32.partialorder %v135_v29, %v141_v42 }
  0xd4   :  { %v146_v43 = vsel %vm144_vm5, %v142_v38, 128.0 }
  0xd5   :  { %v150_v44 = vsel %vm119_vm0, %v146_v43, inf }
  0xd6   :  { %151 = vmin.xlane.f32.xlu1 %v150_v44 }
 0x112   :  { %v122_v45 = vpop.xlane.xlu0 %121 }
 0x113   :  { %vm126_vm6 = vcmp.gt.f32.partialorder %v122_v45, 0.0 }
 0x114   :  { %v156_v48 = vsel %vm126_vm6, 4.0, %v155_v46 }
 0x115   :  { %v158_v4 = vsel %vm119_vm0, %v156_v48, inf }
 0x116   :  { %v125_v47 = vpop.xlane.xlu1 %124  ;;  %v159_v50 = vrot.slane %v158_v4, 4 }
 0x117   :  { %vm127_vm7 = vcmp.gt.f32.partialorder %v125_v47, 0.0 }
 0x118   :  { %v157_v49 = vsel %vm127_vm7, 4.0, %v155_v46  ;;  %v160_v52 = vmin.f32 %v158_v4, %v159_v50 }
 0x119   :  { %v165_v51 = vsel %vm119_vm0, %v157_v49, inf }
 0x11a   :  { %v166_v53 = vrot.slane %v165_v51, 4  ;;  %v161_v54 = vrot.slane %v160_v52, 2 }
 0x11c   :  { %v167_v55 = vmin.f32 %v165_v51, %v166_v53  ;;  %v162_v56 = vmin.f32 %v160_v52, %v161_v54 }
 0x11e   :  { %v168_v57 = vrot.slane %v167_v55, 2  ;;  %v163_v58 = vrot.slane %v162_v56, 1 }
 0x120   :  { %v169_v59 = vmin.f32 %v167_v55, %v168_v57  ;;  %v164_v60 = vmin.f32 %v162_v56, %v163_v58 }
 0x122   :  { %v170_v3 = vrot.slane %v169_v59, 1  ;;  %vm172_vm8 = vcmp.lt.f32.partialorder %v155_v46, %v164_v60  ;;  %vm176_vm10 = vcmp.eq.f32.partialorder %v155_v46, %v164_v60 }
 0x123   :  { %v174_v1 = vsel %vm172_vm8, %v240_v2, 4294967295 }
 0x124   :  { %v171_v62 = vmin.f32 %v169_v59, %v170_v3 }
 0x126   :  { %vm173_vm11 = vcmp.lt.f32.partialorder %v155_v46, %v171_v62  ;;  %vm177_vm12 = vcmp.eq.f32.partialorder %v155_v46, %v171_v62 }
 0x127   :  { %v175_v10 = vsel %vm173_vm11, %v253_v5, 4294967295 }
 0x15f   :  { %v149_v61 = vpop.xlane.xlu1 %148 }
 0x160   :  { %v190_v63 = vtrunc.f32 %v149_v61 }
 0x162   :  { %v191_v0 = vcvt.f32.s32 %v190_v63 }
 0x163   :  { %v152_v6 = vpop.xlane.xlu1 %151 }
 0x164   :  { %v178_v7 = vsel %vm176_vm10, %v191_v0, %v174_v1  ;;  %v192_v8 = vtrunc.f32 %v152_v6 }
 0x165   :  { %181 = vst.msk [vmem:[%s307_s5] sm:$0xf] %vm180_vm9, %v178_v7 }
 0x166   :  { %v193_v9 = vcvt.f32.s32 %v192_v8 }
 0x168   :  { %v179_v11 = vsel %vm177_vm12, %v193_v9, %v175_v10 }
 0x169   :  { %182 = vst.msk [vmem:[%s307_s5 + $0x8] sm:$0xf] %vm180_vm9, %v179_v11 }

</bundles_post_ra>
